<compile_context>
chip_gen: v7x
topology: tpu7x:2x2x1
jax: 0.10.0
libtpu: 0.0.40
codegen_flags: <defaults>
</compile_context>

<pallas_src>
import functools
import math

import jax
import jax.numpy as jnp
from jax import lax
from jax.experimental import pallas as pl
from jax.experimental.pallas import tpu as pltpu

_MIB = 1024 * 1024


def _cdiv(a, b):
    return -(-a // b)


def _round_up(x, m):
    return -(-x // m) * m


def _tpu_flavor():
    """Best-effort generation / VMEM query with safe fallbacks."""
    kind = ""
    try:
        kind = jax.devices()[0].device_kind.lower()
    except Exception:
        pass
    is_v7 = "v7" in kind
    multi_core = is_v7 or ("v5p" in kind) or ("v4" in kind)  # 2 TCs / megacore
    vmem_cap = 64 * _MIB if is_v7 else 128 * _MIB
    try:
        vmem_cap = int(pltpu.get_tpu_info().vmem_capacity_bytes)
    except Exception:
        pass
    return is_v7, multi_core, vmem_cap


def _budget(is_v7, vmem_cap):
    """(target_block_bytes, max_block_bytes, vmem_limit_bytes) per generation."""
    if is_v7:
        target, blk_max, limit = 8 * _MIB, 12 * _MIB, 48 * _MIB
    else:
        target, blk_max, limit = 12 * _MIB, 16 * _MIB, 64 * _MIB
    limit = max(16 * _MIB, min(limit, (vmem_cap * 3) // 4))
    # Keep the double-buffered input (+ small output/scratch) under the limit.
    blk_max = max(_MIB, min(blk_max, (limit - 4 * _MIB) // 2))
    target = max(_MIB // 2, min(target, blk_max))
    return target, blk_max, limit


def _row_tile(rows_total, row_bytes, sub, target_bytes, min_blocks):
    """Balanced row-block size: multiple of `sub`, ~target bytes, >= min_blocks."""
    n_blk = max(min_blocks, _cdiv(rows_total * row_bytes, target_bytes), 1)
    r = _round_up(_cdiv(rows_total, n_blk), sub)
    if r >= rows_total:
        return rows_total, 1          # single full-extent block (always legal)
    return r, _cdiv(rows_total, r)


# --------------------------------------------------------------------------- #
# Kernels
# --------------------------------------------------------------------------- #
def _gap_single_kernel(x_ref, o_ref, *, inv_hw):
    # Hot path: x_ref (r_tile, HW), o_ref (1, 1, r_tile) lane-dense output.
    s = jnp.sum(x_ref[...], axis=-1, dtype=jnp.float32) * inv_hw      # (r_tile,)
    o_ref[0, 0, :] = s.astype(o_ref.dtype)


def _gap_tiled_kernel(x_ref, o_ref, acc_ref, *, inv_hw, hw_rem):
    # Huge-HW path: x_ref (r_tile, hw_tile), o_ref (1, 1, r_tile) resident
    # across k, acc_ref (1, r_tile) f32 scratch.
    k = pl.program_id(1)
    nk = pl.num_programs(1)

    @pl.when(k == 0)
    def _init():
        acc_ref[...] = jnp.zeros_like(acc_ref)

    def _accum(mask_tail):
        x = x_ref[...]
        if mask_tail:
            col = lax.broadcasted_iota(jnp.int32, x.shape, 1)
            x = jnp.where(col < hw_rem, x, jnp.zeros_like(x))
        acc_ref[0, :] += jnp.sum(x, axis=-1, dtype=jnp.float32)

    if hw_rem is None:
        _accum(False)
    else:
        # Mask only the ragged last spatial tile (gated, not every tile).
        @pl.when(k < nk - 1)
        def _full_tiles():
            _accum(False)

        @pl.when(k == nk - 1)
        def _tail_tile():
            _accum(True)

    @pl.when(k == nk - 1)
    def _finalize():
        o_ref[0, 0, :] = (acc_ref[0, :] * inv_hw).astype(o_ref.dtype)


def _gap_packed_kernel(x_ref, seg_ref, o_ref, *, inv_hw):
    # Small-HW path: x_ref (r_tile, g*HW), seg_ref (g*HW, g) 0/1 segment matrix,
    # o_ref (r_tile, g). Segmented spatial sum on the MXU (f32 accumulation).
    acc = jnp.dot(x_ref[...], seg_ref[...], preferred_element_type=jnp.float32)
    o_ref[...] = (acc * inv_hw).astype(o_ref.dtype)


# --------------------------------------------------------------------------- #
# Wrapper
# --------------------------------------------------------------------------- #
def global_avg_pool2d(x):
    """x: (N, C, H, W) -> (N, C), mean over spatial dims (H, W)."""
    N, C, H, W = x.shape
    HW = H * W
    NC = N * C
    if NC == 0:
        return jnp.zeros((N, C), x.dtype)

    itemsize = jnp.dtype(x.dtype).itemsize
    sub = max(8, 32 // itemsize)          # packed-row (sublane) granularity
    inv_hw = 1.0 / HW

    is_v7, multi_core, vmem_cap = _tpu_flavor()
    target, blk_max, vmem_limit = _budget(is_v7, vmem_cap)
    min_blocks = 2 if multi_core else 1   # keep both TensorCores busy on v7x

    x_rows = x.reshape(NC, HW)            # contiguous reshape, no data movement

    def _cparams(sems):
        return pltpu.CompilerParams(dimension_semantics=sems,
                                    vmem_limit_bytes=vmem_limit)

    # ---- small-HW packed path (HW not a multiple of 128, e.g. 7x7, 14x14) ----
    if HW % 128 != 0:
        g = 128 // math.gcd(HW, 128)
        while g * HW * itemsize < 512:    # keep each HBM->VMEM row >= 512 B
            g *= 2
        row_bytes = g * HW * itemsize
        if NC % g == 0 and row_bytes <= _MIB:
            rows_total = NC // g
            r_tile, n_blk = _row_tile(rows_total, row_bytes, 8, target, min_blocks)
            # 0/1 block-diagonal matrix: column j sums the HW spatial positions
            # of the j-th (n, c) row inside a packed group.
            seg = jnp.repeat(jnp.eye(g, dtype=x.dtype), HW, axis=0)   # (g*HW, g)
            out = pl.pallas_call(
                functools.partial(_gap_packed_kernel, inv_hw=inv_hw),
                out_shape=jax.ShapeDtypeStruct((rows_total, g), x.dtype),
                grid_spec=pltpu.PrefetchScalarGridSpec(
                    num_scalar_prefetch=0,
                    grid=(n_blk,),
                    in_specs=[
                        pl.BlockSpec((r_tile, g * HW), lambda r: (r, 0)),
                        pl.BlockSpec((g * HW, g), lambda r: (0, 0)),
                    ],
                    out_specs=pl.BlockSpec((r_tile, g), lambda r: (r, 0)),
                ),
                compiler_params=_cparams(("parallel",)),
            )(x_rows.reshape(rows_total, g * HW), seg)
            return out.reshape(N, C)

    # ---- main path: one (n, c) row per VMEM row, lanes = spatial extent ------
    if sub * _round_up(HW, 128) * itemsize > blk_max:
        # Enormous spatial extent: tile HW (multiple of 128), f32 accumulator.
        hw_tile = max(128, (blk_max // (sub * itemsize)) // 128 * 128)
    else:
        hw_tile = HW                      # full spatial extent per block

    lane_padded = _round_up(hw_tile, 128)
    row_bytes = lane_padded * itemsize
    r_tile, n_rblk = _row_tile(NC, row_bytes, sub, target, min_blocks)

    out_shape = jax.ShapeDtypeStruct((n_rblk, 1, r_tile), x.dtype)

    if hw_tile == HW:
        # Hot path: single spatial tile -> no reduction axis, no scratch.
        out = pl.pallas_call(
            functools.partial(_gap_single_kernel, inv_hw=inv_hw),
            out_shape=out_shape,
            grid_spec=pltpu.PrefetchScalarGridSpec(
                num_scalar_prefetch=0,
                grid=(n_rblk,),
                in_specs=[pl.BlockSpec((r_tile, hw_tile), lambda r: (r, 0))],
                out_specs=pl.BlockSpec((1, 1, r_tile), lambda r: (r, 0, 0)),
            ),
            compiler_params=_cparams(("parallel",)),
        )(x_rows)
    else:
        n_k = _cdiv(HW, hw_tile)
        hw_rem = HW - (n_k - 1) * hw_tile
        hw_rem = None if hw_rem == hw_tile else hw_rem
        out = pl.pallas_call(
            functools.partial(_gap_tiled_kernel, inv_hw=inv_hw, hw_rem=hw_rem),
            out_shape=out_shape,
            grid_spec=pltpu.PrefetchScalarGridSpec(
                num_scalar_prefetch=0,
                grid=(n_rblk, n_k),
                in_specs=[pl.BlockSpec((r_tile, hw_tile), lambda r, k: (r, k))],
                out_specs=pl.BlockSpec((1, 1, r_tile), lambda r, k: (r, 0, 0)),
                scratch_shapes=[pltpu.VMEM((1, r_tile), jnp.float32)],
            ),
            compiler_params=_cparams(("parallel", "arbitrary")),
        )(x_rows)

    return out.reshape(n_rblk * r_tile)[:NC].reshape(N, C)


if __name__ == "__main__":
    key = jax.random.PRNGKey(0)

    # Primary shape from the module spec.
    N, C, H, W = 2, 4, 16, 16
    x = jax.random.normal(key, (N, C, H, W), dtype=jnp.float32)
    y = global_avg_pool2d(x)
    jax.block_until_ready(y)
    y_ref = jnp.mean(x, axis=(2, 3))
    assert y.shape == (N, C), y.shape
    assert jnp.allclose(y, y_ref, atol=1e-5, rtol=1e-5), "mismatch vs reference"

    # Extra small shapes: classic CNN global-pool tails exercising the packed
    # small-HW path, bf16, and a non-multiple-of-8 NC.
    for shape, dtype in (((2, 256, 7, 7), jnp.float32),
                         ((2, 128, 14, 14), jnp.bfloat16),
                         ((3, 5, 16, 16), jnp.float32)):
        key, sk = jax.random.split(key)
        xi = jax.random.normal(sk, shape, dtype=dtype)
        yi = jax.block_until_ready(global_avg_pool2d(xi))
        ri = jnp.mean(xi.astype(jnp.float32), axis=(2, 3)).astype(dtype)
        tol = 1e-5 if dtype == jnp.float32 else 2e-2
        assert yi.shape == shape[:2], (shape, yi.shape)
        assert jnp.allclose(yi.astype(jnp.float32), ri.astype(jnp.float32),
                            atol=tol, rtol=tol), f"mismatch for {shape}"

    print("KERNEL_OK")
</pallas_src>

<mosaic_0001>
module attributes {stable_mosaic.version = 11 : i64} {
  func.func @_gap_single_kernel(%arg0: i32, %arg1: memref<8x256xf32, #tpu.memory_space<vmem>>, %arg2: memref<1x1x8xf32, #tpu.memory_space<vmem>>) attributes {dimension_semantics = [#tpu.dimension_semantics<parallel>], iteration_bounds = array<i64: 1>, scalar_prefetch = 0 : i64, scratch_operands = 0 : i64, tpu.core_type = #tpu.core_type<tc>, window_params = [{transform_indices = @transform_0, window_bounds = array<i64: 8, 256>}, {transform_indices = @transform_1, window_bounds = array<i64: 1, 1, 8>}]} {
    %c0 = arith.constant 0 : index
    %c0_0 = arith.constant 0 : index
    %0 = vector.load %arg1[%c0, %c0_0] : memref<8x256xf32, #tpu.memory_space<vmem>>, vector<8x256xf32>
    %cst = arith.constant dense<0.000000e+00> : vector<8xf32>
    %1 = vector.multi_reduction <add>, %0, %cst [1] : vector<8x256xf32> to vector<8xf32>
    %cst_1 = arith.constant 3.906250e-03 : f32
    %2 = vector.broadcast %cst_1 : f32 to vector<8xf32>
    %3 = arith.mulf %1, %2 : vector<8xf32>
    %c0_2 = arith.constant 0 : index
    %c0_3 = arith.constant 0 : index
    %c0_4 = arith.constant 0 : index
    %4 = vector.load %arg2[%c0_2, %c0_3, %c0_4] : memref<1x1x8xf32, #tpu.memory_space<vmem>>, vector<1x1x8xf32>
    %5 = vector.shape_cast %4 : vector<1x1x8xf32> to vector<8xf32>
    %6 = vector.shape_cast %3 : vector<8xf32> to vector<1x1x8xf32>
    tpu.vector_store %arg2[%c0_2, %c0_3, %c0_4], %6 {strides = array<i32>} : memref<1x1x8xf32, #tpu.memory_space<vmem>>, vector<1x1x8xf32>,
    return
  }
  func.func @transform_0(%arg0: i32) -> (i32, i32) {
    %c0_i32 = arith.constant 0 : i32
    %c0_i32_0 = arith.constant 0 : i32
    return %arg0, %c0_i32 : i32, i32
  }
  func.func @transform_1(%arg0: i32) -> (i32, i32, i32) {
    %c0_i32 = arith.constant 0 : i32
    %c0_i32_0 = arith.constant 0 : i32
    %c0_i32_1 = arith.constant 0 : i32
    return %arg0, %c0_i32, %c0_i32_0 : i32, i32, i32
  }
}

</mosaic_0001>

<bundles_post_ra>
// kernel: tpu_custom_call.1
= control target key start
LH: loop header
LB: loop body
LE: loop exit
PB: predicated region body
PF: predicated region fallthrough
CT: control target
= control target key end

     0   :  { %6 = vsyncpa [#allocation3], 0  ;;  %s138_s0 = inlined_call_operand.hbm [shape: f32[8,256], index: 0, kind: input, shape index: {}]   ;;  %s139_s1 = inlined_call_operand.hbm [shape: f32[1,1,8], index: 1, kind: output, shape index: {}]  }
   0x1   :  { %7 = vsyncpa [#allocation4], 0  ;;  %s102_s6 = smov [#allocation2]   ;;  %s54_s10 = scalar_lea.hbm %s138_s0, 256 }
   0x2   :  { %s14_s7 = sshll.u32 %s102_s6, 4  ;;  %p55_p0 = scmp.ne.s32.totalorder %s138_s0, %s54_s10  ;;  %s15_s7 = int_to_ptr.vmem [resolvable:$true] %s14_s7 }
   0x3   :  { %p58_p1 = scmp.lt.u32.totalorder %s54_s10, %s138_s0 }
   0x5   :  { %p60_p2 = pnand %p58_p1, %p55_p0 }
   0x7   :  { %63 = shalt.err (!%p60_p2)
}
   0x8   :  { %s64_s15 = scalar_lea.vmem %s15_s7, 256  ;;  %p69_p4 = scmp.lt.s32.totalorder %s15_s7, %s15_s7 }
   0x9   :  { %p65_p3 = scmp.ne.s32.totalorder %s15_s7, %s64_s15  ;;  %p70_p5 = scmp.lt.s32.totalorder %s64_s15, %s64_s15 }
   0xb   :  { %p71_p6 = por %p70_p5, %p69_p4 }
   0xd   :  { %p72_p7 = pnand %p71_p6, %p65_p3 }
   0xf   :  { %75 = shalt.err (!%p72_p7)
}
  0x10   :  { %17 = dma.hbm_to_vmem [thread:$0]  %s138_s0, 256, %s15_s7, [#allocation3]  }
  0x11   :  { %98 = dma.done.wait [#allocation3], 256  }
  0x12   :  { %99 = vsyncadd [#allocation3], 4294967040  ;;  %v21_v0 = vld [vmem:[#allocation2] sm:$0xff]  ;;  %v22_v1 = vld [vmem:[#allocation2 + $0x8] sm:$0xff]  ;;  %v28_v3 = vlaneseq  ;;  %s103_s18 = smov [#allocation5]   ;;  %vm35_vm0 = vcmask 57344  }
  0x13   :  { %v23_v2 = vadd.f32 %v22_v1, %v21_v0  ;;  %s43_s19 = sshll.u32 %s103_s18, 4  ;;  %s44_s19 = int_to_ptr.vmem [resolvable:$true] %s43_s19 }
  0x14   :  { %v29_v4 = vand.u32 127, %v28_v3  ;;  %v31_v5 = vshrl.u32 %v28_v3, 7  ;;  %s76_s20 = scalar_lea.vmem %s44_s19, 16  ;;  %s80_s0 = scalar_lea.vmem %s44_s19, 32 }
  0x15   :  { %24 = vadd.xlane.f32.xlu0 %v23_v2  ;;  %p77_p8 = scmp.ne.s32.totalorder %s44_s19, %s76_s20  ;;  %p81_p9 = scmp.lt.s32.totalorder %s44_s19, %s44_s19 }
  0x16   :  { %v32_v6 = vsub.s32 %v29_v4, %v31_v5  ;;  %p82_p10 = scmp.lt.s32.totalorder %s80_s0, %s76_s20 }
  0x18   :  { %p83_p11 = por %p82_p10, %p81_p9 }
  0x1a   :  { %p84_p12 = pnand %p83_p11, %p77_p8 }
  0xa2   :  { %v25_v7 = vpop.xlane.xlu0 %24 }
  0xa3   :  { %v26_v8 = vmul.f32 0.00390625, %v25_v7 }
  0xa5   :  { %v33_v9 = vrot.slane %v26_v8, %v32_v6 }
  0xa7   :  { %36 = vst.msk [vmem:[#allocation5] sm:$0x1] %vm35_vm0, %v33_v9 }
  0xa8   :  { %87 = shalt.err (!%p84_p12)
}
  0xa9   :  { %s88_s23 = scalar_lea.hbm %s139_s1, 16 }
  0xaa   :  { %p89_p13 = scmp.ne.s32.totalorder %s139_s1, %s88_s23  ;;  %p92_p0 = scmp.lt.u32.totalorder %s88_s23, %s139_s1 }
  0xac   :  { %p94_p1 = pnand %p92_p0, %p89_p13 }
  0xae   :  { %97 = shalt.err (!%p94_p1)
}
  0xaf   :  { %46 = dma.vmem_to_hbm [thread:$0]  %s44_s19, 16, %s139_s1, [#allocation4]  }
  0xb0   :  { %100 = dma.done.wait [#allocation4], 16  }
  0xb1   :  { %101 = vsyncadd [#allocation4], 4294967280 }
  0xb2   :  { %50 = vsyncpa [#allocation3], 1 }
  0xb3   :  { %51 = vsyncpa [#allocation4], 1 }

</bundles_post_ra>
